<compile_context>
chip_gen: v7x
topology: tpu7x:2x2x1
jax: 0.10.0
libtpu: 0.0.40
codegen_flags: <defaults>
</compile_context>

<pallas_src>
import functools
import math

import jax
import jax.numpy as jnp
from jax import lax
from jax.experimental import pallas as pl
from jax.experimental.pallas import tpu as pltpu

CLS_ID = 2                      # PMC_CLIP hard-codes self.cls_id = 2
MXU_DTYPE = jnp.bfloat16        # matmul operand dtype (accumulation stays f32)
VMEM_LIMIT = 32 * 1024 * 1024   # safe scoped-VMEM cap on v5e/v6e/v7x


def _round_up(x, m):
    return (x + m - 1) // m * m


def _row_block(M, target=512):
    """Row-tile choice for elementwise kernels: full extent when small."""
    if M <= target:
        return M, M
    return target, _round_up(M, target)


def _pick_tile(dim, target, mult):
    """Block size for a tiled axis; prefer divisors so no padding is needed."""
    if dim <= target:
        return dim, dim                      # full extent (exempt from 8/128 rule)
    for cand in range(target, mult - 1, -mult):
        if dim % cand == 0:
            return cand, dim
    return target, _round_up(dim, target)    # fallback: pad


def _pick_batch_block(B, cap=8):
    bb = min(B, cap)
    while B % bb != 0:
        bb -= 1
    return bb


# ----------------------------------------------------------------------------
# Fused matmul kernel: (M,K)@(K,N) + bias + activation epilogue, out_dtype cast
# ----------------------------------------------------------------------------
def _mm_epilogue(y, t, act):
    if t is not None:
        y = y + t
    if act == "relu":
        y = jnp.maximum(y, 0.0)
    elif act == "gelu":
        # TODO(synk): torch nn.GELU is the exact erf form; tanh approximation
        # is used inside the kernel (EUP-friendly), numerically very close.
        y = jax.nn.gelu(y, approximate=True)
    return y


def _mm_kernel_1k(*refs, act, has_bias):
    if has_bias:
        a_ref, b_ref, t_ref, o_ref = refs
        t = t_ref[...]
    else:
        a_ref, b_ref, o_ref = refs
        t = None
    y = jnp.dot(a_ref[...].astype(MXU_DTYPE), b_ref[...].astype(MXU_DTYPE),
                preferred_element_type=jnp.float32)
    o_ref[...] = _mm_epilogue(y, t, act).astype(o_ref.dtype)


def _mm_kernel_acc(*refs, act, has_bias):
    if has_bias:
        a_ref, b_ref, t_ref, o_ref, acc_ref = refs
    else:
        a_ref, b_ref, o_ref, acc_ref = refs
        t_ref = None

    @pl.when(pl.program_id(2) == 0)
    def _():
        acc_ref[...] = jnp.zeros_like(acc_ref)

    acc_ref[...] += jnp.dot(a_ref[...].astype(MXU_DTYPE),
                            b_ref[...].astype(MXU_DTYPE),
                            preferred_element_type=jnp.float32)

    @pl.when(pl.program_id(2) == pl.num_programs(2) - 1)
    def _():
        t = t_ref[...] if has_bias else None
        o_ref[...] = _mm_epilogue(acc_ref[...], t, act).astype(o_ref.dtype)


def matmul_fused(a, b, shift=None, act="none", out_dtype=jnp.float32,
                 tm=256, tn=256, tk=512, max_single_k=1024):
    """MXU matmul with fused (+bias, +relu/gelu) epilogue and out_dtype cast.

    Weights (b) are expected pre-cast to MXU dtype at init.  The activation
    tile is cast inside the kernel, so no wrapper-side astype pass is made."""
    M, K = a.shape
    K2, N = b.shape
    assert K == K2
    has_bias = shift is not None

    bm, Mp = _pick_tile(M, tm, 8)
    bn, Np = _pick_tile(N, tn, 128)
    if K <= max_single_k:
        bk, Kp = K, K
    else:
        bk, Kp = _pick_tile(K, tk, 128)

    if Mp != M or Kp != K:
        a = jnp.pad(a, ((0, Mp - M), (0, Kp - K)))
    if Kp != K or Np != N:
        b = jnp.pad(b, ((0, Kp - K), (0, Np - N)))

    ops = [a, b]
    if has_bias:
        t = shift.reshape(1, N).astype(jnp.float32)
        if Np != N:
            t = jnp.pad(t, ((0, 0), (0, Np - N)))
        ops.append(t)

    nk = Kp // bk
    if nk == 1:
        in_specs = [pl.BlockSpec((bm, Kp), lambda i, j: (i, 0)),
                    pl.BlockSpec((Kp, bn), lambda i, j: (0, j))]
        if has_bias:
            in_specs.append(pl.BlockSpec((1, bn), lambda i, j: (0, j)))
        out = pl.pallas_call(
            functools.partial(_mm_kernel_1k, act=act, has_bias=has_bias),
            out_shape=jax.ShapeDtypeStruct((Mp, Np), out_dtype),
            grid=(Mp // bm, Np // bn),
            in_specs=in_specs,
            out_specs=pl.BlockSpec((bm, bn), lambda i, j: (i, j)),
            compiler_params=pltpu.CompilerParams(
                dimension_semantics=("parallel", "parallel"),
                vmem_limit_bytes=VMEM_LIMIT),
        )(*ops)
    else:
        in_specs = [pl.BlockSpec((bm, bk), lambda i, j, k: (i, k)),
                    pl.BlockSpec((bk, bn), lambda i, j, k: (k, j))]
        if has_bias:
            in_specs.append(pl.BlockSpec((1, bn), lambda i, j, k: (0, j)))
        out = pl.pallas_call(
            functools.partial(_mm_kernel_acc, act=act, has_bias=has_bias),
            out_shape=jax.ShapeDtypeStruct((Mp, Np), out_dtype),
            grid_spec=pltpu.PrefetchScalarGridSpec(
                num_scalar_prefetch=0,
                grid=(Mp // bm, Np // bn, nk),
                in_specs=in_specs,
                out_specs=pl.BlockSpec((bm, bn), lambda i, j, k: (i, j)),
                scratch_shapes=[pltpu.VMEM((bm, bn), jnp.float32)]),
            compiler_params=pltpu.CompilerParams(
                dimension_semantics=("parallel", "parallel", "arbitrary"),
                vmem_limit_bytes=VMEM_LIMIT),
        )(*ops)
    if Mp != M or Np != N:
        out = out[:M, :N]
    return out


# ----------------------------------------------------------------------------
# Row-tiled elementwise / LayerNorm / pooling kernels (VPU)
# ----------------------------------------------------------------------------
def _add_kernel(a_ref, b_ref, o_ref, *, relu):
    y = a_ref[...] + b_ref[...]
    if relu:
        y = jnp.maximum(y, 0.0)
    o_ref[...] = y.astype(o_ref.dtype)


def residual_add(a, b, relu=False):
    """Elementwise add (+ReLU); operands are viewed lane-dense as (-1, 128)."""
    shp = a.shape
    out_dtype = jnp.result_type(a.dtype, b.dtype)
    total = a.size
    lane = 128 if total % 128 == 0 else shp[-1]
    a2 = a.reshape(-1, lane)
    b2 = b.reshape(-1, lane)
    M, N = a2.shape
    bm, Mp = _row_block(M)
    if Mp != M:
        a2 = jnp.pad(a2, ((0, Mp - M), (0, 0)))
        b2 = jnp.pad(b2, ((0, Mp - M), (0, 0)))
    out = pl.pallas_call(
        functools.partial(_add_kernel, relu=relu),
        out_shape=jax.ShapeDtypeStruct((Mp, N), out_dtype),
        grid=(Mp // bm,),
        in_specs=[pl.BlockSpec((bm, N), lambda i: (i, 0)),
                  pl.BlockSpec((bm, N), lambda i: (i, 0))],
        out_specs=pl.BlockSpec((bm, N), lambda i: (i, 0)),
        compiler_params=pltpu.CompilerParams(
            dimension_semantics=("parallel",), vmem_limit_bytes=VMEM_LIMIT),
    )(a2, b2)
    if Mp != M:
        out = out[:M]
    return out.reshape(shp)


def _ln_body(x, g, b, eps):
    x = x.astype(jnp.float32)
    mu = jnp.mean(x, axis=-1, keepdims=True)
    var = jnp.mean(jnp.square(x - mu), axis=-1, keepdims=True)
    return (x - mu) * lax.rsqrt(var + eps) * g + b


def _ln_kernel(x_ref, g_ref, b_ref, o_ref, *, eps):
    o_ref[...] = _ln_body(x_ref[...], g_ref[...], b_ref[...], eps)


def _add_ln_kernel(x_ref, y_ref, g_ref, b_ref, o_ref, *, eps):
    o_ref[...] = _ln_body(x_ref[...] + y_ref[...], g_ref[...], b_ref[...], eps)


def _add_ln_dual_kernel(x_ref, y_ref, g_ref, b_ref, s_ref, ln_ref, *, eps):
    s = x_ref[...] + y_ref[...]
    s_ref[...] = s
    ln_ref[...] = _ln_body(s, g_ref[...], b_ref[...], eps)


def _ln_call(kernel, arrays, gamma, beta, n_out, eps):
    shp = arrays[0].shape
    N = shp[-1]
    flats = [a.reshape(-1, N) for a in arrays]
    M = flats[0].shape[0]
    bm, Mp = _row_block(M)
    if Mp != M:
        flats = [jnp.pad(a, ((0, Mp - M), (0, 0))) for a in flats]
    row_spec = pl.BlockSpec((bm, N), lambda i: (i, 0))
    vec_spec = pl.BlockSpec((1, N), lambda i: (0, 0))
    out_shape = tuple(jax.ShapeDtypeStruct((Mp, N), jnp.float32)
                      for _ in range(n_out))
    out_specs = tuple(pl.BlockSpec((bm, N), lambda i: (i, 0))
                      for _ in range(n_out))
    if n_out == 1:
        out_shape, out_specs = out_shape[0], out_specs[0]
    outs = pl.pallas_call(
        functools.partial(kernel, eps=eps),
        out_shape=out_shape,
        grid=(Mp // bm,),
        in_specs=[row_spec] * len(flats) + [vec_spec, vec_spec],
        out_specs=out_specs,
        compiler_params=pltpu.CompilerParams(
            dimension_semantics=("parallel",), vmem_limit_bytes=VMEM_LIMIT),
    )(*flats, gamma.reshape(1, N), beta.reshape(1, N))
    if n_out == 1:
        outs = (outs,)
    outs = tuple((o[:M] if Mp != M else o).reshape(shp) for o in outs)
    return outs


def layer_norm(x, gamma, beta, eps=1e-5):
    return _ln_call(_ln_kernel, [x], gamma, beta, 1, eps)[0]


def add_layer_norm(x, y, gamma, beta, eps=1e-5):
    """Fused residual-add + LayerNorm (post-LN BERT blocks): LN(x + y)."""
    return _ln_call(_add_ln_kernel, [x, y], gamma, beta, 1, eps)[0]


def add_ln_dual(x, y, gamma, beta, eps=1e-5):
    """Pre-LN fusion blocks: returns (x + y, LN(x + y)) in one HBM pass."""
    return _ln_call(_add_ln_dual_kernel, [x, y], gamma, beta, 2, eps)


def _pool_mean_kernel(x_ref, o_ref, *, k):
    acc = x_ref[:, 0, :].astype(jnp.float32)
    for i in range(1, k):              # static sublane-offset loads, lane-dense
        acc = acc + x_ref[:, i, :].astype(jnp.float32)
    o_ref[...] = (acc * (1.0 / k)).astype(o_ref.dtype)


def _chunk_mean(x3):
    """(M, k, N) -> (M, N): mean over the middle (sublane) axis."""
    M, k, N = x3.shape
    bm, Mp = _row_block(M)
    if Mp != M:
        x3 = jnp.pad(x3, ((0, Mp - M), (0, 0), (0, 0)))
    out = pl.pallas_call(
        functools.partial(_pool_mean_kernel, k=k),
        out_shape=jax.ShapeDtypeStruct((Mp, N), x3.dtype),
        grid=(Mp // bm,),
        in_specs=[pl.BlockSpec((bm, k, N), lambda i: (i, 0, 0))],
        out_specs=pl.BlockSpec((bm, N), lambda i: (i, 0)),
        compiler_params=pltpu.CompilerParams(
            dimension_semantics=("parallel",), vmem_limit_bytes=VMEM_LIMIT),
    )(x3)
    if Mp != M:
        out = out[:M]
    return out


def avg_pool(x, k):
    """AvgPool2d(k) as two VPU sublane-mean passes (no MXU, no im2col)."""
    if k == 1:
        return x
    B, H, W, C = x.shape
    Ho, Wo = H // k, W // k
    xh = _chunk_mean(x.reshape(B * Ho, k, W * C))        # mean over H window
    xw = _chunk_mean(xh.reshape(B * Ho * Wo, k, C))      # mean over W window
    return xw.reshape(B, Ho, Wo, C)


# ----------------------------------------------------------------------------
# Multi-head attention: packed QKV / KV split inside the kernel,
# several batch elements per grid step, bf16 MXU operands, f32 accumulation.
# ----------------------------------------------------------------------------
def _attend_head(q, k, v, scale, out_dtype):
    qh = (q * scale).astype(MXU_DTYPE)          # fold 1/sqrt(dh) into q once
    kh = k.astype(MXU_DTYPE)
    vh = v.astype(MXU_DTYPE)
    s = jnp.dot(qh, kh.T, preferred_element_type=jnp.float32)
    s = s - jnp.max(s, axis=-1, keepdims=True)
    p = jnp.exp(s)
    p = p * pl.reciprocal(jnp.sum(p, axis=-1, keepdims=True), approx=True)
    o = jnp.dot(p.astype(MXU_DTYPE), vh, preferred_element_type=jnp.float32)
    return o.astype(out_dtype)


def _mha_packed_kernel(qkv_ref, o_ref, *, num_heads, d_model, scale):
    Bb = qkv_ref.shape[0]
    dh = d_model // num_heads
    for b in range(Bb):                         # static unrolled
        t = qkv_ref[b]                          # (L, 3D)
        for h in range(num_heads):
            sl = slice(h * dh, (h + 1) * dh)
            q = t[:, h * dh:(h + 1) * dh]
            k = t[:, d_model + h * dh:d_model + (h + 1) * dh]
            v = t[:, 2 * d_model + h * dh:2 * d_model + (h + 1) * dh]
            o_ref[b, :, sl] = _attend_head(q, k, v, scale, o_ref.dtype)


def _mha_kv_kernel(q_ref, kv_ref, o_ref, *, num_heads, d_model, scale):
    Bb = q_ref.shape[0]
    dh = d_model // num_heads
    for b in range(Bb):
        qa = q_ref[b]                           # (Lq, D)
        kv = kv_ref[b]                          # (Lk, 2D)
        for h in range(num_heads):
            sl = slice(h * dh, (h + 1) * dh)
            q = qa[:, sl]
            k = kv[:, h * dh:(h + 1) * dh]
            v = kv[:, d_model + h * dh:d_model + (h + 1) * dh]
            o_ref[b, :, sl] = _attend_head(q, k, v, scale, o_ref.dtype)


def mha_self_packed(qkv, num_heads):
    """qkv: (B, L, 3D) packed projections -> (B, L, D) bf16.  No mask (the
    PMC_CLIP fusion module is built without an attn_mask)."""
    B, L, threeD = qkv.shape
    D = threeD // 3
    scale = 1.0 / math.sqrt(D // num_heads)
    Bb = _pick_batch_block(B)
    return pl.pallas_call(
        functools.partial(_mha_packed_kernel, num_heads=num_heads,
                          d_model=D, scale=scale),
        out_shape=jax.ShapeDtypeStruct((B, L, D), MXU_DTYPE),
        grid=(B // Bb,),
        in_specs=[pl.BlockSpec((Bb, L, threeD), lambda i: (i, 0, 0))],
        out_specs=pl.BlockSpec((Bb, L, D), lambda i: (i, 0, 0)),
        compiler_params=pltpu.CompilerParams(
            dimension_semantics=("parallel",), vmem_limit_bytes=VMEM_LIMIT),
    )(qkv)


def mha_cross_kv(q, kv, num_heads):
    """q: (B, Lq, D); kv: (B, Lk, 2D) packed -> (B, Lq, D) bf16."""
    B, Lq, D = q.shape
    Lk = kv.shape[1]
    scale = 1.0 / math.sqrt(D // num_heads)
    Bb = _pick_batch_block(B)
    return pl.pallas_call(
        functools.partial(_mha_kv_kernel, num_heads=num_heads,
                          d_model=D, scale=scale),
        out_shape=jax.ShapeDtypeStruct((B, Lq, D), MXU_DTYPE),
        grid=(B // Bb,),
        in_specs=[pl.BlockSpec((Bb, Lq, D), lambda i: (i, 0, 0)),
                  pl.BlockSpec((Bb, Lk, 2 * D), lambda i: (i, 0, 0))],
        out_specs=pl.BlockSpec((Bb, Lq, D), lambda i: (i, 0, 0)),
        compiler_params=pltpu.CompilerParams(
            dimension_semantics=("parallel",), vmem_limit_bytes=VMEM_LIMIT),
    )(q, kv)


# ----------------------------------------------------------------------------
# Neural-net building blocks (glue around the kernels)
# ----------------------------------------------------------------------------
def linear(x, lp, act="none", out_dtype=jnp.float32):
    """lp = {'w': (K,N) pre-cast MXU weight, optional 'b': (N,)} — bias and
    activation are fused into the matmul epilogue; out_dtype cast in-kernel."""
    shp = x.shape
    x2 = x.reshape(-1, shp[-1])
    y = matmul_fused(x2, lp["w"], shift=lp.get("b"), act=act,
                     out_dtype=out_dtype)
    return y.reshape(shp[:-1] + (lp["w"].shape[1],))


def conv2d_bn(x, cp, relu=False):
    """x NHWC.  cp carries the pre-reshaped (kh*kw*Cin, Cout) weight with the
    BN scale already folded in; BN shift (+ReLU) runs in the matmul epilogue."""
    kh, kw, stride, pad, cin = cp["kh"], cp["kw"], cp["stride"], cp["pad"], cp["cin"]
    if pad:
        x = jnp.pad(x, ((0, 0), (pad, pad), (pad, pad), (0, 0)))
    B, H, W, _ = x.shape
    Ho = (H - kh) // stride + 1
    Wo = (W - kw) // stride + 1
    if kh == 1 and kw == 1 and stride == 1:
        patches = x.reshape(B * Ho * Wo, cin)
    else:
        # TODO(synk): im2col patches are still materialized in HBM; could be
        # generated inside the matmul via a kh*kw reduction grid axis whose
        # index_map selects shifted windows of the padded input.
        cols = []
        for i in range(kh):
            for j in range(kw):
                cols.append(x[:, i:i + stride * Ho:stride,
                               j:j + stride * Wo:stride, :])
        patches = jnp.concatenate(cols, axis=-1).reshape(B * Ho * Wo,
                                                         kh * kw * cin)
    y = matmul_fused(patches, cp["w2d"], shift=cp["shift"],
                     act="relu" if relu else "none", out_dtype=MXU_DTYPE)
    return y.reshape(B, Ho, Wo, y.shape[-1])


def bottleneck(x, p):
    stride = p["stride"]
    out = conv2d_bn(x, p["conv1"], relu=True)
    out = conv2d_bn(out, p["conv2"], relu=True)
    if stride > 1:
        out = avg_pool(out, stride)
    out = conv2d_bn(out, p["conv3"], relu=False)
    if "down" in p:
        idn = avg_pool(x, stride) if stride > 1 else x
        idn = conv2d_bn(idn, p["down"], relu=False)
    else:
        idn = x
    return residual_add(out, idn, relu=True)


def attention_pool(x, p, num_heads):
    B, H, W, C = x.shape
    t = x.reshape(B, H * W, C).astype(jnp.float32)
    t = jnp.concatenate([jnp.mean(t, axis=1, keepdims=True), t], axis=1)
    t = t + p["pos_emb"][None, :, :]
    q = linear(t[:, :1, :], p["q"], out_dtype=MXU_DTYPE)
    kv = linear(t, p["kv"], out_dtype=MXU_DTYPE)      # fused K/V projection
    o = mha_cross_kv(q, kv, num_heads)
    o = linear(o, p["c"])
    return o[:, 0, :]


def modified_resnet(image_nchw, p, heads):
    x = jnp.transpose(image_nchw, (0, 2, 3, 1))          # NCHW -> NHWC
    x = conv2d_bn(x, p["conv1"], relu=True)
    x = conv2d_bn(x, p["conv2"], relu=True)
    x = conv2d_bn(x, p["conv3"], relu=True)
    x = avg_pool(x, 2)
    for stage in p["stages"]:
        for blk in stage:
            x = bottleneck(x, blk)
    feats = attention_pool(x, p["attnpool"], heads)
    return {"image_features": feats}


def bert_encoder(input_ids, p, num_heads):
    # TODO(synk): HF tokenizer + pretrained PubMedBERT replaced by a synthetic
    # deterministic BERT-style encoder; padding attention mask omitted.
    B, L = input_ids.shape
    x = p["word_emb"][input_ids] + p["pos_emb"][None, :L, :]
    x = layer_norm(x, p["emb_ln_g"], p["emb_ln_b"], eps=1e-12)
    for lp in p["layers"]:
        qkv = linear(x, lp["qkv"], out_dtype=MXU_DTYPE)   # fused Q/K/V matmul
        a = mha_self_packed(qkv, num_heads)
        a = linear(a, lp["o"])
        x = add_layer_norm(x, a, lp["ln1_g"], lp["ln1_b"], eps=1e-12)
        h = linear(x, lp["ff1"], act="gelu", out_dtype=MXU_DTYPE)
        h = linear(h, lp["ff2"])
        x = add_layer_norm(x, h, lp["ln2_g"], lp["ln2_b"], eps=1e-12)
    return x


def fusion_transformer(x, p, num_heads):
    # CLIP-style pre-LN residual attention blocks (no attn_mask in PMC_CLIP).
    layers = p["layers"]
    h = layer_norm(x, layers[0]["ln1_g"], layers[0]["ln1_b"])
    for i, lp in enumerate(layers):
        qkv = linear(h, lp["qkv"], out_dtype=MXU_DTYPE)   # fused Q/K/V matmul
        a = mha_self_packed(qkv, num_heads)
        a = linear(a, lp["o"])
        x, h = add_ln_dual(x, a, lp["ln2_g"], lp["ln2_b"])    # add + LN fused
        m = linear(h, lp["fc"], act="gelu", out_dtype=MXU_DTYPE)
        m = linear(m, lp["proj"])
        if i + 1 < len(layers):
            x, h = add_ln_dual(x, m, layers[i + 1]["ln1_g"],
                               layers[i + 1]["ln1_b"])
        else:
            x = residual_add(x, m)
    return x


# ----------------------------------------------------------------------------
# PMC_CLIP forward
# ----------------------------------------------------------------------------
def pmc_clip_forward(params, batch):
    image = batch["images"]                 # (B, 3, H, W)  NCHW, like torch
    input_ids = batch["bert_input_ids"]     # (B, context_length)  int32
    label_ids = batch["bert_label_ids"]     # (B, context_length)  int32

    # encode_image
    visual_out = modified_resnet(image, params["visual"],
                                 params["cfg"]["vision_heads"])
    image_features = visual_out["image_features"]          # (B, embed_dim)

    # encode_text
    x = bert_encoder(input_ids, params["text_encoder"],
                     params["cfg"]["bert_heads"])           # (B, L, D)
    B, L, D = x.shape

    # token with id == cls_id (exactly one per row, mirrors nonzero()[:,1])
    cls_pos = jnp.argmax((input_ids == CLS_ID).astype(jnp.int32), axis=1)
    cls_hidden = x[jnp.arange(B), cls_pos]                   # (B, D)
    text_features = matmul_fused(cls_hidden, params["text_projection"])

    img = image_features[:, None, :]                         # (B, 1, D)
    img_special = jnp.broadcast_to(params["img_special_token"], (B, 1, D))
    fused = jnp.concatenate([x, img_special, img], axis=1)   # (B, L+2, D)
    # torch permutes (B,L,D)->(L,B,D) around the fusion transformer; our
    # kernels are batch-first so the two permutes cancel.
    fused = fusion_transformer(fused, params["fusion"],
                               params["cfg"]["fusion_heads"])
    fused = fused[:, :-2, :]
    bert_prediction = fused                                  # args.mlm == True

    return {
        "image_features": image_features,
        "text_features": text_features,
        "logit_scale": jnp.exp(params["logit_scale"]),
        "bert_label": label_ids,
        "bert_prediction": bert_prediction,
        "attentions": None,
    }


# ----------------------------------------------------------------------------
# Deterministic parameter construction (weights pre-reshaped / pre-cast,
# BN scale folded into the conv weight, Q/K/V fused at init)
# ----------------------------------------------------------------------------
def init_params(key, *, embed_dim=64, image_size=32, vision_width=8,
                vision_layers=(1, 1, 1, 1), head_width=64, text_width=64,
                context_length=8, vocab_size=128, bert_layers=2, bert_heads=4,
                fusion_layers=1, fusion_heads=4):
    keys = iter(jax.random.split(key, 256))

    def nrm(shape, std=0.02):
        return std * jax.random.normal(next(keys), shape, dtype=jnp.float32)

    def conv_p(kh, kw, cin, cout, stride, pad, bn_eps=1e-5):
        w = nrm((kh, kw, cin, cout))
        # BN with PyTorch init stats (mean=0, var=1, gamma=1, beta=0):
        # gamma/sqrt(var+eps) is folded into the weight columns, only the
        # shift remains in the matmul epilogue.
        gamma = jnp.ones((cout,), jnp.float32)
        beta = jnp.zeros((cout,), jnp.float32)
        mean = jnp.zeros((cout,), jnp.float32)
        var = jnp.ones((cout,), jnp.float32)
        scale = gamma / jnp.sqrt(var + bn_eps)
        shift = beta - mean * scale
        w2d = (w.reshape(kh * kw * cin, cout) * scale[None, :]).astype(MXU_DTYPE)
        return dict(w2d=w2d, kh=kh, kw=kw, cin=cin, stride=stride, pad=pad,
                    shift=shift)

    def lin_p(k, n, std=0.02, bias=True):
        d = dict(w=nrm((k, n), std).astype(MXU_DTYPE))
        if bias:
            d["b"] = jnp.zeros((n,), jnp.float32)
        return d

    # --- visual tower: tiny ModifiedRN50 ------------------------------------
    w = vision_width
    visual = dict(
        conv1=conv_p(3, 3, 3, w // 2, stride=2, pad=1),
        conv2=conv_p(3, 3, w // 2, w // 2, stride=1, pad=1),
        conv3=conv_p(3, 3, w // 2, w, stride=1, pad=1),
    )
    stages, inplanes = [], w
    planes_list = [w, w * 2, w * 4, w * 8]
    for s_idx, nblocks in enumerate(vision_layers):
        planes, stage = planes_list[s_idx], []
        for b_idx in range(nblocks):
            stride = 2 if (s_idx > 0 and b_idx == 0) else 1
            blk = dict(stride=stride,
                       conv1=conv_p(1, 1, inplanes, planes, stride=1, pad=0),
                       conv2=conv_p(3, 3, planes, planes, stride=1, pad=1),
                       conv3=conv_p(1, 1, planes, planes * 4, stride=1, pad=0))
            if stride > 1 or inplanes != planes * 4:
                blk["down"] = conv_p(1, 1, inplanes, planes * 4, stride=1, pad=0)
            inplanes = planes * 4
            stage.append(blk)
        stages.append(stage)
    visual["stages"] = stages
    vis_dim = w * 32
    vision_heads = vis_dim // head_width
    spacial = image_size // 32
    visual["attnpool"] = dict(
        pos_emb=nrm((spacial * spacial + 1, vis_dim), std=vis_dim ** -0.5),
        q=lin_p(vis_dim, vis_dim),
        kv=lin_p(vis_dim, 2 * vis_dim),          # fused K/V projection
        c=lin_p(vis_dim, embed_dim),
    )

    # --- text encoder (synthetic BERT stand-in) -----------------------------
    text = dict(
        word_emb=nrm((vocab_size, text_width)),
        pos_emb=nrm((context_length, text_width)),
        emb_ln_g=jnp.ones((text_width,), jnp.float32),
        emb_ln_b=jnp.zeros((text_width,), jnp.float32),
        layers=[],
    )
    for _ in range(bert_layers):
        text["layers"].append(dict(
            qkv=lin_p(text_width, 3 * text_width),    # fused Q/K/V projection
            o=lin_p(text_width, text_width),
            ln1_g=jnp.ones((text_width,), jnp.float32),
            ln1_b=jnp.zeros((text_width,), jnp.float32),
            ff1=lin_p(text_width, text_width * 4),
            ff2=lin_p(text_width * 4, text_width),
            ln2_g=jnp.ones((text_width,), jnp.float32),
            ln2_b=jnp.zeros((text_width,), jnp.float32),
        ))

    # --- fusion transformer --------------------------------------------------
    fusion = dict(layers=[])
    for _ in range(fusion_layers):
        fusion["layers"].append(dict(
            ln1_g=jnp.ones((text_width,), jnp.float32),
            ln1_b=jnp.zeros((text_width,), jnp.float32),
            qkv=lin_p(text_width, 3 * text_width),    # fused Q/K/V projection
            o=lin_p(text_width, text_width),
            ln2_g=jnp.ones((text_width,), jnp.float32),
            ln2_b=jnp.zeros((text_width,), jnp.float32),
            fc=lin_p(text_width, text_width * 4),
            proj=lin_p(text_width * 4, text_width),
        ))

    return dict(
        visual=visual,
        text_encoder=text,
        fusion=fusion,
        text_projection=nrm((text_width, embed_dim),
                            std=text_width ** -0.5).astype(MXU_DTYPE),
        # created because args.mlm=True in __init__, but unused in forward:
        mlm_projection=nrm((text_width, vocab_size), std=text_width ** -0.5),
        img_special_token=jnp.zeros((1, 1, embed_dim), jnp.float32),
        logit_scale=jnp.asarray(math.log(1.0 / 0.07), jnp.float32),
        cfg=dict(vision_heads=vision_heads, bert_heads=bert_heads,
                 fusion_heads=fusion_heads),
    )


# ----------------------------------------------------------------------------
if __name__ == "__main__":
    B = 2
    IMAGE_SIZE = 32
    CONTEXT_LENGTH = 8
    VOCAB = 128
    EMBED_DIM = 64

    params = init_params(jax.random.PRNGKey(1), embed_dim=EMBED_DIM,
                         image_size=IMAGE_SIZE, context_length=CONTEXT_LENGTH,
                         vocab_size=VOCAB)

    key = jax.random.PRNGKey(0)
    k_img, k_ids, k_lbl = jax.random.split(key, 3)
    images = jax.random.normal(k_img, (B, 3, IMAGE_SIZE, IMAGE_SIZE),
                               dtype=jnp.float32)
    input_ids = jax.random.randint(k_ids, (B, CONTEXT_LENGTH), 3, VOCAB,
                                   dtype=jnp.int32)
    # place exactly one cls_id(=2) token per row (stand-in for tokenizer output)
    cls_cols = jnp.array([CONTEXT_LENGTH - 1, CONTEXT_LENGTH - 2],
                         dtype=jnp.int32)
    input_ids = input_ids.at[jnp.arange(B), cls_cols].set(CLS_ID)
    label_ids = jax.random.randint(k_lbl, (B, CONTEXT_LENGTH), 3, VOCAB,
                                   dtype=jnp.int32)

    batch = {"images": images,
             "bert_input_ids": input_ids,
             "bert_label_ids": label_ids}

    out = pmc_clip_forward(params, batch)
    jax.block_until_ready((out["image_features"], out["text_features"],
                           out["logit_scale"], out["bert_prediction"]))

    assert out["image_features"].shape == (B, EMBED_DIM)
    assert out["text_features"].shape == (B, EMBED_DIM)
    assert out["bert_prediction"].shape == (B, CONTEXT_LENGTH, EMBED_DIM)
    print("KERNEL_OK")
</pallas_src>

<mosaic_0001>
module attributes {stable_mosaic.version = 11 : i64} {
  func.func @_mm_kernel_1k(%arg0: i32, %arg1: i32, %arg2: memref<256x27xf32, #tpu.memory_space<vmem>>, %arg3: memref<27x4xbf16, #tpu.memory_space<vmem>>, %arg4: memref<1x4xf32, #tpu.memory_space<vmem>>, %arg5: memref<256x4xbf16, #tpu.memory_space<vmem>>) attributes {dimension_semantics = [#tpu.dimension_semantics<parallel>, #tpu.dimension_semantics<parallel>], iteration_bounds = array<i64: 2, 1>, scalar_prefetch = 0 : i64, scratch_operands = 0 : i64, tpu.core_type = #tpu.core_type<tc>, window_params = [{transform_indices = @transform_0, window_bounds = array<i64: 256, 27>}, {transform_indices = @transform_1, window_bounds = array<i64: 27, 4>}, {transform_indices = @transform_2, window_bounds = array<i64: 1, 4>}, {transform_indices = @transform_3, window_bounds = array<i64: 256, 4>}]} {
    %c0 = arith.constant 0 : index
    %c0_0 = arith.constant 0 : index
    %0 = vector.load %arg4[%c0, %c0_0] : memref<1x4xf32, #tpu.memory_space<vmem>>, vector<1x4xf32>
    %c0_1 = arith.constant 0 : index
    %c0_2 = arith.constant 0 : index
    %1 = vector.load %arg2[%c0_1, %c0_2] : memref<256x27xf32, #tpu.memory_space<vmem>>, vector<256x27xf32>
    %2 = arith.truncf %1 : vector<256x27xf32> to vector<256x27xbf16>
    %c0_3 = arith.constant 0 : index
    %c0_4 = arith.constant 0 : index
    %3 = vector.load %arg3[%c0_3, %c0_4] : memref<27x4xbf16, #tpu.memory_space<vmem>>, vector<27x4xbf16>
    %cst = arith.constant dense<0.000000e+00> : vector<256x4xf32>
    %4 = tpu.matmul %2, %3, %cst {dimension_numbers = #tpu.dot_dimension_numbers<[1], [0], [0], [1], [0, 0, 1, 1], [], []>} : vector<256x27xbf16>, vector<27x4xbf16>, vector<256x4xf32> -> vector<256x4xf32>
    %5 = vector.broadcast %0 : vector<1x4xf32> to vector<256x4xf32>
    %6 = arith.addf %4, %5 : vector<256x4xf32>
    %cst_5 = arith.constant 0.000000e+00 : f32
    %7 = vector.broadcast %cst_5 : f32 to vector<256x4xf32>
    %8 = arith.maximumf %6, %7 : vector<256x4xf32>
    %9 = arith.truncf %8 : vector<256x4xf32> to vector<256x4xbf16>
    %c0_6 = arith.constant 0 : index
    %c0_7 = arith.constant 0 : index
    %10 = vector.load %arg5[%c0_6, %c0_7] : memref<256x4xbf16, #tpu.memory_space<vmem>>, vector<256x4xbf16>
    tpu.vector_store %arg5[%c0_6, %c0_7], %9 {strides = array<i32>} : memref<256x4xbf16, #tpu.memory_space<vmem>>, vector<256x4xbf16>,
    return
  }
  func.func @transform_0(%arg0: i32, %arg1: i32) -> (i32, i32) {
    %c0_i32 = arith.constant 0 : i32
    %c0_i32_0 = arith.constant 0 : i32
    return %arg0, %c0_i32 : i32, i32
  }
  func.func @transform_1(%arg0: i32, %arg1: i32) -> (i32, i32) {
    %c0_i32 = arith.constant 0 : i32
    %c0_i32_0 = arith.constant 0 : i32
    return %c0_i32, %arg1 : i32, i32
  }
  func.func @transform_2(%arg0: i32, %arg1: i32) -> (i32, i32) {
    %c0_i32 = arith.constant 0 : i32
    %c0_i32_0 = arith.constant 0 : i32
    return %c0_i32, %arg1 : i32, i32
  }
  func.func @transform_3(%arg0: i32, %arg1: i32) -> (i32, i32) {
    %c0_i32 = arith.constant 0 : i32
    return %arg0, %arg1 : i32, i32
  }
}

</mosaic_0001>

<bundles_post_ra>
// kernel: tpu_custom_call.1
= control target key start
LH: loop header
LB: loop body
LE: loop exit
PB: predicated region body
PF: predicated region fallthrough
CT: control target
= control target key end

     0   :  { %s1034_s12 = smov 0   ;;  %s1036_s13 = smov 0   ;;  %s1230_s0 = inlined_call_operand.vmem [shape: f32[512,27], index: 0, kind: input, shape index: {}]   ;;  %s1231_s1 = inlined_call_operand.vmem [shape: bf16[27,4], index: 1, kind: input, shape index: {}]   ;;  %s1232_s2 = inlined_call_operand.vmem [shape: f32[1,4], index: 2, kind: input, shape index: {}]   ;;  %s1233_s3 = inlined_call_operand.vmem [shape: bf16[512,4], index: 3, kind: output, shape index: {}]  }
   0x1   :  { %s1038_s14 = smov 0  }
   0x2 LB: > { %s25_s15 = sadd.s32 1, %s1007_s13  ;;  %p814_p0 = scmp.ge.s32.totalorder %s1011_s14, 1  ;;  %s1011_s14 = sphi %s1038_s14, %s13_s14   ;;  %s1007_s13 = sphi %s1036_s13, %s1235_s13   ;;  %s1003_s12 = sphi %s1034_s12, %s1234_s12  }
   0x3   : > { %p27_p1 = scmp.ge.s32.totalorder %s25_s15, 2  ;;  %p169_p2 = scmp.lt.s32.totalorder %s1011_s14, 3 }
   0x5   : > { %s1237_s15 = smov (%p27_p1, %s25_s15), 0  ;;  %p170_p3 = pnand %p814_p0, %p169_p2 }
   0x6   : > { %v987_v0 = vld [vmem:[%s1231_s1] sm:$0xff] (!%p170_p3)   ;;  %vm345_vm0 = vcmask (!%p170_p3), 1044480   ;;  %v988_v1 = vld [vmem:[%s1231_s1 + $0x8] sm:$0x3f] (!%p170_p3)   ;;  %vm346_vm1 = vcmask (!%p170_p3), 1045504   ;;  %s815_s20 = sshll.u32 (!%p170_p3), %s1003_s12, 5 }
   0x7   : > { %173 = sbr.rel (%p170_p3) target bundleno = 268 (0x10c), region = 32  ;;  %922 = vmatprep.subr.bf16.mxu0 (!%p170_p3), %v987_v0  ;;  %958 = vmatprep.subr.bf16.mxu1 (!%p170_p3), %v987_v0  ;;  %v1013_v2 = vmov (!%p170_p3), 65535   ;;  %p204_p4 = scmp.lt.s32.totalorder (!%p170_p3), %s815_s20, 63  ;;  %vm296_vm2 = vcmask (!%p170_p3), 220160   ;;  %v1117_v54 = vld [vmem:[%s1232_s2] ss:$0 sm:$0xff] (!%p170_p3) }
   0x8   : > { %923 = vmatpush3.bf16.msra.mxu0 (!%p170_p3), %v987_v0  ;;  %960 = vmatpush3.bf16.msra.mxu1 (!%p170_p3), %v987_v0  ;;  %v347_v3 = vsel (!%p170_p3), %vm345_vm0, 4294967295, %v1013_v2  ;;  %vm673_vm3 = vcmask (!%p170_p3), 27648  }
   0x9   : > { %v348_v4 = vsel (!%p170_p3), %vm346_vm1, %v347_v3, 0 }
   0xa   : > { %v350_v5 = vand.u32 (!%p170_p3), %v988_v1, %v348_v4 }
   0xc   : > { %924 = vmatprep.subr.bf16.mxu0 (!%p170_p3), %v350_v5  ;;  %959 = vmatprep.subr.bf16.mxu1 (!%p170_p3), %v350_v5 }
   0xd   : > { %925 = vmatpush3.bf16.msra.mxu0 (!%p170_p3), %v350_v5  ;;  %961 = vmatpush3.bf16.msra.mxu1 (!%p170_p3), %v350_v5 }
   0xe   : > { %s1239_s20 = smov (!%p204_p4, %s815_s20), 63 }
   0xf   : > { %s816_s21 = sshll.u32 %s1239_s20, 3  ;;  %s818_s27 = sshll.u32 %s1239_s20, 2 }
  0x10   : > { %s1064_s24 = scalar_lea.vmem %s1230_s0, %s816_s21  ;;  %s1128_s30 = scalar_lea.vmem %s1233_s3, %s818_s27 }
  0x11   : > { %v227_v6 = vld [vmem:[%s1064_s24] sm:$0xff]  ;;  %v228_v7 = vld [vmem:[%s1064_s24 + $0x8] sm:$0xff]  ;;  %v229_v11 = vld [vmem:[%s1064_s24 + $0x10] sm:$0xff] }
  0x12   : > { %v243_v8 = vld [vmem:[%s1064_s24 + $0x80] sm:$0xff]  ;;  %v259_v9 = vpack.c.bf16 %v228_v7, %v227_v6  ;;  %v244_v10 = vld [vmem:[%s1064_s24 + $0x88] sm:$0xff]  ;;  %v230_v12 = vld [vmem:[%s1064_s24 + $0x18] sm:$0xff] }
  0x13   : > { %v267_v13 = vpack.c.bf16 %v244_v10, %v243_v8  ;;  %v260_v14 = vpack.c.bf16 %v230_v12, %v229_v11  ;;  %v245_v15 = vld [vmem:[%s1064_s24 + $0x90] sm:$0xff]  ;;  %v246_v16 = vld [vmem:[%s1064_s24 + $0x98] sm:$0xff]  ;;  %v231_v17 = vld [vmem:[%s1064_s24 + $0x20] sm:$0xff] }
  0x14   : > { %926 = vmatprep.mubr.msk.bf16.mxu0 %vm296_vm2, %v259_v9  ;;  %v268_v18 = vpack.c.bf16 %v246_v16, %v245_v15  ;;  %v232_v19 = vld [vmem:[%s1064_s24 + $0x28] sm:$0xff]  ;;  %v247_v20 = vld [vmem:[%s1064_s24 + $0xa0] sm:$0xff]  ;;  %v233_v24 = vld [vmem:[%s1064_s24 + $0x30] sm:$0xff] }
  0x15   : > { %v248_v21 = vld [vmem:[%s1064_s24 + $0xa8] sm:$0xff]  ;;  %942 = vmatprep.mubr.msk.bf16.mxu1 %vm296_vm2, %v267_v13  ;;  %927 = vmatmul.mubr.msk.bf16.vlgmr.msra.gmra.mrb[0].mxu0 %vm296_vm2, %v260_v14  ;;  %v261_v22 = vpack.c.bf16 %v232_v19, %v231_v17  ;;  %v234_v25 = vld [vmem:[%s1064_s24 + $0x38] sm:$0xff]  ;;  %v249_v26 = vld [vmem:[%s1064_s24 + $0xb0] sm:$0xff] }
  0x16   : > { %v269_v23 = vpack.c.bf16 %v248_v21, %v247_v20  ;;  %943 = vmatmul.mubr.msk.bf16.vlgmr.msra.gmra.mrb[0].mxu1 %vm296_vm2, %v268_v18  ;;  %v250_v27 = vld [vmem:[%s1064_s24 + $0xb8] sm:$0xff]  ;;  %v235_v28 = vld [vmem:[%s1064_s24 + $0x40] sm:$0xff]  ;;  %v236_v29 = vld [vmem:[%s1064_s24 + $0x48] sm:$0xff]  ;;  %v262_v32 = vpack.c.bf16 %v234_v25, %v233_v24 }
  0x17   : > { %930 = vmatprep.mubr.msk.bf16.mxu0 %vm296_vm2, %v261_v22  ;;  %v251_v30 = vld [vmem:[%s1064_s24 + $0xc0] sm:$0xff]  ;;  %v252_v31 = vld [vmem:[%s1064_s24 + $0xc8] sm:$0xff]  ;;  %v270_v33 = vpack.c.bf16 %v250_v27, %v249_v26  ;;  %v263_v34 = vpack.c.bf16 %v236_v29, %v235_v28  ;;  %v237_v36 = vld [vmem:[%s1064_s24 + $0x50] sm:$0xff] }
  0x18   : > { %946 = vmatprep.mubr.msk.bf16.mxu1 %vm296_vm2, %v269_v23  ;;  %v271_v35 = vpack.c.bf16 %v252_v31, %v251_v30  ;;  %v238_v37 = vld [vmem:[%s1064_s24 + $0x58] sm:$0xff]  ;;  %v253_v38 = vld [vmem:[%s1064_s24 + $0xd0] sm:$0xff]  ;;  %v239_v40 = vld [vmem:[%s1064_s24 + $0x60] sm:$0xff] }
  0x19   : > { %v254_v39 = vld [vmem:[%s1064_s24 + $0xd8] sm:$0xff]  ;;  %v240_v41 = vld [vmem:[%s1064_s24 + $0x68] sm:$0xff]  ;;  %v255_v42 = vld [vmem:[%s1064_s24 + $0xe0] sm:$0xff]  ;;  %v264_v44 = vpack.c.bf16 %v238_v37, %v237_v36 }
  0x1a   : > { %v256_v43 = vld [vmem:[%s1064_s24 + $0xe8] sm:$0xff]  ;;  %v272_v45 = vpack.c.bf16 %v254_v39, %v253_v38  ;;  %v265_v46 = vpack.c.bf16 %v240_v41, %v239_v40  ;;  %v241_v48 = vld [vmem:[%s1064_s24 + $0x70] sm:$0xff]  ;;  %v242_v49 = vld [vmem:[%s1064_s24 + $0x78] sm:$0xff] }
  0x1b   : > { %v273_v47 = vpack.c.bf16 %v256_v43, %v255_v42  ;;  %v257_v50 = vld [vmem:[%s1064_s24 + $0xf0] sm:$0xff]  ;;  %v258_v51 = vld [vmem:[%s1064_s24 + $0xf8] sm:$0xff]  ;;  %v266_v52 = vpack.c.bf16 %v242_v49, %v241_v48 }
  0x1c   : > { %v274_v53 = vpack.c.bf16 %v258_v51, %v257_v50 }
  0x1d   : > { %931 = vmatmul.mubr.msk.bf16.gmra.mrb[4].mxu0 %vm296_vm2, %v262_v32 }
  0x1e   : > { %947 = vmatmul.mubr.msk.bf16.gmra.mrb[4].mxu1 %vm296_vm2, %v270_v33  ;;  %934 = vmatprep.mubr.msk.bf16.mxu0 %vm296_vm2, %v263_v34 }
  0x1f   : > { %950 = vmatprep.mubr.msk.bf16.mxu1 %vm296_vm2, %v271_v35 }
  0x25   : > { %935 = vmatmul.mubr.msk.bf16.gmra.mrb[8].mxu0 %vm296_vm2, %v264_v44 }
  0x26   : > { %951 = vmatmul.mubr.msk.bf16.gmra.mrb[8].mxu1 %vm296_vm2, %v272_v45  ;;  %938 = vmatprep.mubr.msk.bf16.mxu0 %vm296_vm2, %v265_v46 }
  0x27   : > { %954 = vmatprep.mubr.msk.bf16.mxu1 %vm296_vm2, %v273_v47 }
  0x2d   : > { %939 = vmatmul.mubr.msk.bf16.gmra.mrb[12].mxu0 %vm296_vm2, %v266_v52 }
  0x2e   : > { %955 = vmatmul.mubr.msk.bf16.gmra.mrb[12].mxu1 %vm296_vm2, %v274_v53 }
  0xe8   : > { %v928_v55 = vpop.f32.mrb[0].mxu0 }
  0xe9   : > { %v395_v56 = vadd.f32 %v928_v55, %v1117_v54  ;;  %v944_v57 = vpop.f32.mrb[0].mxu1  ;;  %v386_v58 = vpop.f32.mrb[1].mxu0 }
  0xea   : > { %v459_v59 = vadd.f32 %v944_v57, %v1117_v54  ;;  %v387_v60 = vadd.f32 %v1117_v54, %v386_v58  ;;  %v450_v61 = vpop.f32.mrb[1].mxu1  ;;  %v929_v62 = vpop.f32.mrb[2].mxu0 }
  0xeb   : > { %v515_v63 = vmax.f32 %v395_v56, 0.0  ;;  %v451_v0 = vadd.f32 %v1117_v54, %v450_v61  ;;  %v398_v1 = vadd.f32 %v929_v62, %v1117_v54  ;;  %v945_v2 = vpop.f32.mrb[2].mxu1  ;;  %v389_v3 = vpop.f32.mrb[3].mxu0 }
  0xec   : > { %v531_v4 = vmax.f32 %v459_v59, 0.0  ;;  %v513_v5 = vmax.f32 %v387_v60, 0.0  ;;  %v462_v6 = vadd.f32 %v945_v2, %v1117_v54  ;;  %v390_v7 = vadd.f32 %v1117_v54, %v389_v3  ;;  %v453_v8 = vpop.f32.mrb[3].mxu1 }
  0xed   : > { %v874_v9 = vpack.c.bf16 %v515_v63, %v515_v63  ;;  %v529_v10 = vmax.f32 %v451_v0, 0.0  ;;  %v516_v11 = vmax.f32 %v398_v1, 0.0  ;;  %v454_v12 = vadd.f32 %v1117_v54, %v453_v8 }
  0xee   : > { %v890_v13 = vpack.c.bf16 %v531_v4, %v531_v4  ;;  %v872_v14 = vpack.c.bf16 %v513_v5, %v513_v5  ;;  %v532_v15 = vmax.f32 %v462_v6, 0.0  ;;  %v514_v16 = vmax.f32 %v390_v7, 0.0 }
  0xef   : > { %676 = vst.msk [vmem:[%s1128_s30 + $0x8] sm:$0xf] %vm673_vm3, %v874_v9  ;;  %v888_v17 = vpack.c.bf16 %v529_v10, %v529_v10  ;;  %v875_v18 = vpack.c.bf16 %v516_v11, %v516_v11  ;;  %v530_v19 = vmax.f32 %v454_v12, 0.0 }
  0xf0   : > { %692 = vst.msk [vmem:[%s1128_s30 + $0x48] sm:$0xf] %vm673_vm3, %v890_v13  ;;  %674 = vst.msk [vmem:[%s1128_s30] sm:$0xf] %vm673_vm3, %v872_v14  ;;  %v891_v20 = vpack.c.bf16 %v532_v15, %v532_v15  ;;  %v873_v21 = vpack.c.bf16 %v514_v16, %v514_v16  ;;  %v932_v22 = vpop.f32.mrb[4].mxu0 }
  0xf1   : > { %690 = vst.msk [vmem:[%s1128_s30 + $0x40] sm:$0xf] %vm673_vm3, %v888_v17  ;;  %677 = vst.msk [vmem:[%s1128_s30 + $0xc] sm:$0xf] %vm673_vm3, %v875_v18  ;;  %v889_v23 = vpack.c.bf16 %v530_v19, %v530_v19  ;;  %v411_v24 = vadd.f32 %v932_v22, %v1117_v54  ;;  %v948_v25 = vpop.f32.mrb[4].mxu1  ;;  %v402_v26 = vpop.f32.mrb[5].mxu0 }
  0xf2   : > { %693 = vst.msk [vmem:[%s1128_s30 + $0x4c] sm:$0xf] %vm673_vm3, %v891_v20  ;;  %675 = vst.msk [vmem:[%s1128_s30 + $0x4] sm:$0xf] %vm673_vm3, %v873_v21  ;;  %v475_v27 = vadd.f32 %v948_v25, %v1117_v54  ;;  %v403_v28 = vadd.f32 %v1117_v54, %v402_v26  ;;  %v466_v29 = vpop.f32.mrb[5].mxu1  ;;  %v933_v30 = vpop.f32.mrb[6].mxu0 }
  0xf3   : > { %691 = vst.msk [vmem:[%s1128_s30 + $0x44] sm:$0xf] %vm673_vm3, %v889_v23  ;;  %v519_v31 = vmax.f32 %v411_v24, 0.0  ;;  %v467_v32 = vadd.f32 %v1117_v54, %v466_v29  ;;  %v414_v33 = vadd.f32 %v933_v30, %v1117_v54  ;;  %v949_v34 = vpop.f32.mrb[6].mxu1  ;;  %v405_v35 = vpop.f32.mrb[7].mxu0 }
  0xf4   : > { %v535_v36 = vmax.f32 %v475_v27, 0.0  ;;  %v517_v37 = vmax.f32 %v403_v28, 0.0  ;;  %v478_v38 = vadd.f32 %v949_v34, %v1117_v54  ;;  %v406_v39 = vadd.f32 %v1117_v54, %v405_v35  ;;  %v469_v40 = vpop.f32.mrb[7].mxu1 }
  0xf5   : > { %v878_v41 = vpack.c.bf16 %v519_v31, %v519_v31  ;;  %v533_v42 = vmax.f32 %v467_v32, 0.0  ;;  %v520_v43 = vmax.f32 %v414_v33, 0.0  ;;  %v470_v44 = vadd.f32 %v1117_v54, %v469_v40 }
  0xf6   : > { %v894_v45 = vpack.c.bf16 %v535_v36, %v535_v36  ;;  %v876_v46 = vpack.c.bf16 %v517_v37, %v517_v37  ;;  %v536_v47 = vmax.f32 %v478_v38, 0.0  ;;  %v518_v48 = vmax.f32 %v406_v39, 0.0 }
  0xf7   : > { %680 = vst.msk [vmem:[%s1128_s30 + $0x18] sm:$0xf] %vm673_vm3, %v878_v41  ;;  %v892_v49 = vpack.c.bf16 %v533_v42, %v533_v42  ;;  %v879_v50 = vpack.c.bf16 %v520_v43, %v520_v43  ;;  %v534_v51 = vmax.f32 %v470_v44, 0.0 }
  0xf8   : > { %696 = vst.msk [vmem:[%s1128_s30 + $0x58] sm:$0xf] %vm673_vm3, %v894_v45  ;;  %678 = vst.msk [vmem:[%s1128_s30 + $0x10] sm:$0xf] %vm673_vm3, %v876_v46  ;;  %v895_v52 = vpack.c.bf16 %v536_v47, %v536_v47  ;;  %v877_v53 = vpack.c.bf16 %v518_v48, %v518_v48  ;;  %v936_v55 = vpop.f32.mrb[8].mxu0 }
  0xf9   : > { %694 = vst.msk [vmem:[%s1128_s30 + $0x50] sm:$0xf] %vm673_vm3, %v892_v49  ;;  %681 = vst.msk [vmem:[%s1128_s30 + $0x1c] sm:$0xf] %vm673_vm3, %v879_v50  ;;  %v893_v56 = vpack.c.bf16 %v534_v51, %v534_v51  ;;  %v427_v57 = vadd.f32 %v936_v55, %v1117_v54  ;;  %v952_v58 = vpop.f32.mrb[8].mxu1  ;;  %v418_v59 = vpop.f32.mrb[9].mxu0 }
  0xfa   : > { %697 = vst.msk [vmem:[%s1128_s30 + $0x5c] sm:$0xf] %vm673_vm3, %v895_v52  ;;  %679 = vst.msk [vmem:[%s1128_s30 + $0x14] sm:$0xf] %vm673_vm3, %v877_v53  ;;  %v491_v60 = vadd.f32 %v952_v58, %v1117_v54  ;;  %v419_v61 = vadd.f32 %v1117_v54, %v418_v59  ;;  %v482_v62 = vpop.f32.mrb[9].mxu1  ;;  %v937_v63 = vpop.f32.mrb[10].mxu0 }
  0xfb   : > { %695 = vst.msk [vmem:[%s1128_s30 + $0x54] sm:$0xf] %vm673_vm3, %v893_v56  ;;  %v523_v0 = vmax.f32 %v427_v57, 0.0  ;;  %v483_v1 = vadd.f32 %v1117_v54, %v482_v62  ;;  %v430_v2 = vadd.f32 %v937_v63, %v1117_v54  ;;  %v953_v3 = vpop.f32.mrb[10].mxu1  ;;  %v421_v4 = vpop.f32.mrb[11].mxu0 }
  0xfc   : > { %v539_v5 = vmax.f32 %v491_v60, 0.0  ;;  %v521_v6 = vmax.f32 %v419_v61, 0.0  ;;  %v494_v7 = vadd.f32 %v953_v3, %v1117_v54  ;;  %v422_v8 = vadd.f32 %v1117_v54, %v421_v4  ;;  %v485_v9 = vpop.f32.mrb[11].mxu1 }
  0xfd   : > { %v882_v10 = vpack.c.bf16 %v523_v0, %v523_v0  ;;  %v537_v11 = vmax.f32 %v483_v1, 0.0  ;;  %v524_v12 = vmax.f32 %v430_v2, 0.0  ;;  %v486_v13 = vadd.f32 %v1117_v54, %v485_v9 }
  0xfe   : > { %v898_v14 = vpack.c.bf16 %v539_v5, %v539_v5  ;;  %v880_v15 = vpack.c.bf16 %v521_v6, %v521_v6  ;;  %v540_v16 = vmax.f32 %v494_v7, 0.0  ;;  %v522_v17 = vmax.f32 %v422_v8, 0.0 }
  0xff   : > { %684 = vst.msk [vmem:[%s1128_s30 + $0x28] sm:$0xf] %vm673_vm3, %v882_v10  ;;  %v896_v18 = vpack.c.bf16 %v537_v11, %v537_v11  ;;  %v883_v19 = vpack.c.bf16 %v524_v12, %v524_v12  ;;  %v538_v20 = vmax.f32 %v486_v13, 0.0 }
 0x100   : > { %700 = vst.msk [vmem:[%s1128_s30 + $0x68] sm:$0xf] %vm673_vm3, %v898_v14  ;;  %682 = vst.msk [vmem:[%s1128_s30 + $0x20] sm:$0xf] %vm673_vm3, %v880_v15  ;;  %v899_v21 = vpack.c.bf16 %v540_v16, %v540_v16  ;;  %v881_v22 = vpack.c.bf16 %v522_v17, %v522_v17  ;;  %v940_v23 = vpop.f32.mrb[12].mxu0 }
 0x101   : > { %698 = vst.msk [vmem:[%s1128_s30 + $0x60] sm:$0xf] %vm673_vm3, %v896_v18  ;;  %685 = vst.msk [vmem:[%s1128_s30 + $0x2c] sm:$0xf] %vm673_vm3, %v883_v19  ;;  %v897_v24 = vpack.c.bf16 %v538_v20, %v538_v20  ;;  %v443_v25 = vadd.f32 %v940_v23, %v1117_v54  ;;  %v956_v26 = vpop.f32.mrb[12].mxu1  ;;  %v434_v27 = vpop.f32.mrb[13].mxu0 }
 0x102   : > { %701 = vst.msk [vmem:[%s1128_s30 + $0x6c] sm:$0xf] %vm673_vm3, %v899_v21  ;;  %683 = vst.msk [vmem:[%s1128_s30 + $0x24] sm:$0xf] %vm673_vm3, %v881_v22  ;;  %v507_v28 = vadd.f32 %v956_v26, %v1117_v54  ;;  %v435_v29 = vadd.f32 %v1117_v54, %v434_v27  ;;  %v498_v30 = vpop.f32.mrb[13].mxu1  ;;  %v941_v31 = vpop.f32.mrb[14].mxu0 }
 0x103   : > { %699 = vst.msk [vmem:[%s1128_s30 + $0x64] sm:$0xf] %vm673_vm3, %v897_v24  ;;  %v527_v32 = vmax.f32 %v443_v25, 0.0  ;;  %v499_v33 = vadd.f32 %v1117_v54, %v498_v30  ;;  %v446_v34 = vadd.f32 %v941_v31, %v1117_v54  ;;  %v957_v35 = vpop.f32.mrb[14].mxu1  ;;  %v437_v36 = vpop.f32.mrb[15].mxu0 }
 0x104   : > { %v543_v37 = vmax.f32 %v507_v28, 0.0  ;;  %v525_v38 = vmax.f32 %v435_v29, 0.0  ;;  %v510_v39 = vadd.f32 %v957_v35, %v1117_v54  ;;  %v438_v40 = vadd.f32 %v1117_v54, %v437_v36  ;;  %v501_v41 = vpop.f32.mrb[15].mxu1 }
 0x105   : > { %v886_v42 = vpack.c.bf16 %v527_v32, %v527_v32  ;;  %v541_v43 = vmax.f32 %v499_v33, 0.0  ;;  %v528_v44 = vmax.f32 %v446_v34, 0.0  ;;  %v502_v45 = vadd.f32 %v1117_v54, %v501_v41 }
 0x106   : > { %v902_v46 = vpack.c.bf16 %v543_v37, %v543_v37  ;;  %v884_v47 = vpack.c.bf16 %v525_v38, %v525_v38  ;;  %v544_v48 = vmax.f32 %v510_v39, 0.0  ;;  %v526_v49 = vmax.f32 %v438_v40, 0.0 }
 0x107   : > { %688 = vst.msk [vmem:[%s1128_s30 + $0x38] sm:$0xf] %vm673_vm3, %v886_v42  ;;  %v900_v50 = vpack.c.bf16 %v541_v43, %v541_v43  ;;  %v887_v51 = vpack.c.bf16 %v528_v44, %v528_v44  ;;  %v542_v52 = vmax.f32 %v502_v45, 0.0 }
 0x108   : > { %704 = vst.msk [vmem:[%s1128_s30 + $0x78] sm:$0xf] %vm673_vm3, %v902_v46  ;;  %686 = vst.msk [vmem:[%s1128_s30 + $0x30] sm:$0xf] %vm673_vm3, %v884_v47  ;;  %v903_v53 = vpack.c.bf16 %v544_v48, %v544_v48  ;;  %v885_v55 = vpack.c.bf16 %v526_v49, %v526_v49 }
 0x109   : > { %702 = vst.msk [vmem:[%s1128_s30 + $0x70] sm:$0xf] %vm673_vm3, %v900_v50  ;;  %689 = vst.msk [vmem:[%s1128_s30 + $0x3c] sm:$0xf] %vm673_vm3, %v887_v51  ;;  %v901_v54 = vpack.c.bf16 %v542_v52, %v542_v52 }
 0x10a   : > { %705 = vst.msk [vmem:[%s1128_s30 + $0x7c] sm:$0xf] %vm673_vm3, %v903_v53  ;;  %687 = vst.msk [vmem:[%s1128_s30 + $0x34] sm:$0xf] %vm673_vm3, %v885_v55 }
 0x10b   : > { %703 = vst.msk [vmem:[%s1128_s30 + $0x74] sm:$0xf] %vm673_vm3, %v901_v54 }
 0x10c PF: > { %s13_s14 = sadd.s32 1, %s1011_s14   ;;  %s1234_s12 = smov %s1007_s13 }
 0x10d   : > { %p10_p5 = scmp.ge.s32.totalorder %s13_s14, 4   ;;  %s1235_s13 = smov %s1237_s15 }
 0x10f   :  { %12 = sbr.rel (!%p10_p5) target bundleno = 2 (0x2), region = 68 }

</bundles_post_ra>
